<compile_context>
chip_gen: v5e
topology: v5e:2x2
jax: 0.10.0
libtpu: 0.0.40
codegen_flags: <defaults>
</compile_context>

<pallas_src>
import jax
import jax.numpy as jnp
from jax.experimental import pallas as pl
from jax.experimental.pallas import tpu as pltpu


LANE = 128      # vreg lane width  -> feature dims padded to multiples of this
SUBLANE = 8     # vreg sublane width -> batch padded to multiples of this
TILE_B = 256    # rows per grid step when tiling over batch.  Keeps the f32
                # intermediate h at TILE_B * H_pad <= 32 vregs (H_pad = 128)
                # and fits comfortably in v7x's 64 MiB VMEM.


def _round_up(n, m):
    return (n + m - 1) // m * m


def encoder_kernel(x_ref, w1_ref, b1_ref, w2_ref, b2_ref, o_ref):
    # x_ref  : (tile_b, D_in_p)   bf16  (MXU inputs)
    # w1_ref : (D_in_p, H_p)      bf16
    # b1_ref : (1, H_p)           f32
    # w2_ref : (H_p, D_out_p)     bf16
    # b2_ref : (1, D_out_p)       f32
    # o_ref  : (tile_b, D_out_p)  f32
    x = x_ref[...]

    # layer 1: bf16 MXU inputs, f32 accumulation; bias + relu stay in f32
    # (VPU filler under the MXU — effectively free).
    h = jnp.dot(x, w1_ref[...], preferred_element_type=jnp.float32)
    h = jnp.maximum(h + b1_ref[...], 0.0)

    # layer 2: cast the activation back to bf16 only for the MXU input.
    y = jnp.dot(h.astype(w2_ref.dtype), w2_ref[...],
                preferred_element_type=jnp.float32)
    y = jnp.maximum(y + b2_ref[...], 0.0)

    o_ref[...] = y.astype(o_ref.dtype)


def encoder_forward(x, w1, b1, w2, b2, *, compute_dtype=jnp.bfloat16):
    """relu(relu(x @ w1 + b1) @ w2 + b2), fused into one Pallas TPU kernel.

    x : (B, D_in); w1 : (D_in, H); b1 : (H,); w2 : (H, D_out); b2 : (D_out,)
    (weights already in (in, out) layout, i.e. transposed from PyTorch's).
    """
    B, D_in = x.shape
    H = w1.shape[1]
    D_out = w2.shape[1]

    # Lane-dense (128-multiple) feature padding; sublane-/tile-aligned batch.
    D_in_p = _round_up(D_in, LANE)
    H_p = _round_up(H, LANE)
    D_out_p = _round_up(D_out, LANE)
    if B <= TILE_B:
        B_p = _round_up(B, SUBLANE)
    else:
        B_p = _round_up(B, TILE_B)

    # Zero padding is semantics-preserving through linear + relu.
    xp = jnp.zeros((B_p, D_in_p), compute_dtype).at[:B, :D_in].set(
        x.astype(compute_dtype))
    w1p = jnp.zeros((D_in_p, H_p), compute_dtype).at[:D_in, :H].set(
        w1.astype(compute_dtype))
    w2p = jnp.zeros((H_p, D_out_p), compute_dtype).at[:H, :D_out].set(
        w2.astype(compute_dtype))
    b1p = jnp.zeros((1, H_p), jnp.float32).at[0, :H].set(
        b1.astype(jnp.float32))
    b2p = jnp.zeros((1, D_out_p), jnp.float32).at[0, :D_out].set(
        b2.astype(jnp.float32))

    out_shape = jax.ShapeDtypeStruct((B_p, D_out_p), jnp.float32)

    if B_p <= TILE_B:
        # Small batch: one invocation, no grid / pipeline machinery at all —
        # the whole problem is a single VMEM tile and any grid step would be
        # pure fixed overhead.
        vmem = pl.BlockSpec(memory_space=pltpu.MemorySpace.VMEM)
        out_p = pl.pallas_call(
            encoder_kernel,
            out_shape=out_shape,
            in_specs=[vmem, vmem, vmem, vmem, vmem],
            out_specs=vmem,
        )(xp, w1p, b1p, w2p, b2p)
    else:
        # Larger batch: tile over rows; weights/biases stay resident
        # (index_map always (0, 0)).  The batch axis is independent, so it is
        # marked "parallel" (shards across both v7x TensorCores; harmless on
        # single-TC v5e/v6e).
        grid = (B_p // TILE_B,)
        out_p = pl.pallas_call(
            encoder_kernel,
            out_shape=out_shape,
            grid=grid,
            in_specs=[
                pl.BlockSpec((TILE_B, D_in_p), lambda i: (i, 0)),
                pl.BlockSpec((D_in_p, H_p), lambda i: (0, 0)),
                pl.BlockSpec((1, H_p), lambda i: (0, 0)),
                pl.BlockSpec((H_p, D_out_p), lambda i: (0, 0)),
                pl.BlockSpec((1, D_out_p), lambda i: (0, 0)),
            ],
            out_specs=pl.BlockSpec((TILE_B, D_out_p), lambda i: (i, 0)),
            compiler_params=pltpu.CompilerParams(
                dimension_semantics=("parallel",),
            ),
        )(xp, w1p, b1p, w2p, b2p)

    # Slice back to the logical (unpadded) result and restore input dtype.
    return out_p[:B, :D_out].astype(x.dtype)


def init_encoder_params(key, D_in, H, D_out, dtype=jnp.float32):
    """Deterministic init mimicking torch.nn.Linear (uniform +/- 1/sqrt(fan_in)).

    Returns weights already transposed to (in, out) layout for the kernel.
    """
    k1, k2, k3, k4 = jax.random.split(key, 4)
    bound1 = 1.0 / jnp.sqrt(D_in)
    bound2 = 1.0 / jnp.sqrt(H)
    w1 = jax.random.uniform(k1, (D_in, H), dtype, minval=-bound1, maxval=bound1)
    b1 = jax.random.uniform(k2, (H,), dtype, minval=-bound1, maxval=bound1)
    w2 = jax.random.uniform(k3, (H, D_out), dtype, minval=-bound2, maxval=bound2)
    b2 = jax.random.uniform(k4, (D_out,), dtype, minval=-bound2, maxval=bound2)
    return w1, b1, w2, b2


if __name__ == "__main__":
    # Shapes consistent with the module: Encoder(D_in=16, H=32, D_out=16)
    D_in, H, D_out = 16, 32, 16

    key = jax.random.PRNGKey(0)
    kx_small, kx_big, kp = jax.random.split(key, 3)
    w1, b1, w2, b2 = init_encoder_params(kp, D_in, H, D_out)

    def ref_fwd(x):
        # Pure-JAX reference with the same bf16 MXU inputs / f32 accumulation.
        h = jnp.dot(x.astype(jnp.bfloat16), w1.astype(jnp.bfloat16),
                    preferred_element_type=jnp.float32) + b1
        h = jnp.maximum(h, 0.0)
        y = jnp.dot(h.astype(jnp.bfloat16), w2.astype(jnp.bfloat16),
                    preferred_element_type=jnp.float32) + b2
        return jnp.maximum(y, 0.0)

    # --- small-batch path: no grid, single VMEM tile -------------------------
    x_small = jax.random.normal(kx_small, (8, D_in), dtype=jnp.float32)
    out_small = jax.block_until_ready(encoder_forward(x_small, w1, b1, w2, b2))
    assert out_small.shape == (8, D_out)
    assert jnp.allclose(out_small, ref_fwd(x_small), atol=2e-2, rtol=2e-2)

    # --- tiled path: grid over batch rows, "parallel" axis --------------------
    x_big = jax.random.normal(kx_big, (512, D_in), dtype=jnp.float32)
    out_big = jax.block_until_ready(encoder_forward(x_big, w1, b1, w2, b2))
    assert out_big.shape == (512, D_out)
    assert jnp.allclose(out_big, ref_fwd(x_big), atol=2e-2, rtol=2e-2)

    print("KERNEL_OK")
</pallas_src>

<mosaic_0001>
module attributes {stable_mosaic.version = 11 : i64} {
  func.func @encoder_kernel(%arg0: memref<8x128xbf16, #tpu.memory_space<vmem>>, %arg1: memref<128x128xbf16, #tpu.memory_space<vmem>>, %arg2: memref<1x128xf32, #tpu.memory_space<vmem>>, %arg3: memref<128x128xbf16, #tpu.memory_space<vmem>>, %arg4: memref<1x128xf32, #tpu.memory_space<vmem>>, %arg5: memref<8x128xf32, #tpu.memory_space<vmem>>) attributes {dimension_semantics = [], scalar_prefetch = 0 : i64, scratch_operands = 0 : i64, tpu.core_type = #tpu.core_type<tc>} {
    %c0 = arith.constant 0 : index
    %c0_0 = arith.constant 0 : index
    %0 = vector.load %arg0[%c0, %c0_0] : memref<8x128xbf16, #tpu.memory_space<vmem>>, vector<8x128xbf16>
    %c0_1 = arith.constant 0 : index
    %c0_2 = arith.constant 0 : index
    %1 = vector.load %arg1[%c0_1, %c0_2] : memref<128x128xbf16, #tpu.memory_space<vmem>>, vector<128x128xbf16>
    %cst = arith.constant dense<0.000000e+00> : vector<8x128xf32>
    %2 = tpu.matmul %0, %1, %cst {dimension_numbers = #tpu.dot_dimension_numbers<[1], [0], [0], [1], [0, 0, 1, 1], [], []>} : vector<8x128xbf16>, vector<128x128xbf16>, vector<8x128xf32> -> vector<8x128xf32>
    %c0_3 = arith.constant 0 : index
    %c0_4 = arith.constant 0 : index
    %3 = vector.load %arg2[%c0_3, %c0_4] : memref<1x128xf32, #tpu.memory_space<vmem>>, vector<1x128xf32>
    %4 = vector.broadcast %3 : vector<1x128xf32> to vector<8x128xf32>
    %5 = arith.addf %2, %4 : vector<8x128xf32>
    %cst_5 = arith.constant 0.000000e+00 : f32
    %6 = vector.broadcast %cst_5 : f32 to vector<8x128xf32>
    %7 = arith.maximumf %5, %6 : vector<8x128xf32>
    %8 = arith.truncf %7 : vector<8x128xf32> to vector<8x128xbf16>
    %c0_6 = arith.constant 0 : index
    %c0_7 = arith.constant 0 : index
    %9 = vector.load %arg3[%c0_6, %c0_7] : memref<128x128xbf16, #tpu.memory_space<vmem>>, vector<128x128xbf16>
    %cst_8 = arith.constant dense<0.000000e+00> : vector<8x128xf32>
    %10 = tpu.matmul %8, %9, %cst_8 {dimension_numbers = #tpu.dot_dimension_numbers<[1], [0], [0], [1], [0, 0, 1, 1], [], []>} : vector<8x128xbf16>, vector<128x128xbf16>, vector<8x128xf32> -> vector<8x128xf32>
    %c0_9 = arith.constant 0 : index
    %c0_10 = arith.constant 0 : index
    %11 = vector.load %arg4[%c0_9, %c0_10] : memref<1x128xf32, #tpu.memory_space<vmem>>, vector<1x128xf32>
    %12 = vector.broadcast %11 : vector<1x128xf32> to vector<8x128xf32>
    %13 = arith.addf %10, %12 : vector<8x128xf32>
    %cst_11 = arith.constant 0.000000e+00 : f32
    %14 = vector.broadcast %cst_11 : f32 to vector<8x128xf32>
    %15 = arith.maximumf %13, %14 : vector<8x128xf32>
    %c0_12 = arith.constant 0 : index
    %c0_13 = arith.constant 0 : index
    %16 = vector.load %arg5[%c0_12, %c0_13] : memref<8x128xf32, #tpu.memory_space<vmem>>, vector<8x128xf32>
    tpu.vector_store %arg5[%c0_12, %c0_13], %15 {strides = array<i32>} : memref<8x128xf32, #tpu.memory_space<vmem>>, vector<8x128xf32>,
    return
  }
}

</mosaic_0001>

<bundles_post_ra>
// kernel: tpu_custom_call.1
= control target key start
LH: loop header
LB: loop body
LE: loop exit
PB: predicated region body
PF: predicated region fallthrough
CT: control target
= control target key end

     0   :  { %10 = vsyncpa [#allocation3], 0  ;;  %s495_s0 = inlined_call_operand.hbm [shape: bf16[8,128], index: 0, kind: input, shape index: {}]   ;;  %s496_s1 = inlined_call_operand.hbm [shape: bf16[128,128], index: 1, kind: input, shape index: {}]   ;;  %s497_s2 = inlined_call_operand.vmem [shape: f32[1,128], index: 2, kind: input, shape index: {}]   ;;  %s498_s3 = inlined_call_operand.hbm [shape: bf16[128,128], index: 3, kind: input, shape index: {}]   ;;  %s499_s4 = inlined_call_operand.vmem [shape: f32[1,128], index: 4, kind: input, shape index: {}]   ;;  %s500_s5 = inlined_call_operand.hbm [shape: f32[8,128], index: 5, kind: output, shape index: {}]  }
   0x1   :  { %11 = vsyncpa [#allocation6], 0  ;;  %s28_s20 = sshll.u32 %s496_s1, 4  ;;  %s29_s20 = int_to_ptr.hbm [resolvable:$true] %s28_s20 }
   0x2   :  { %12 = vsyncpa [#allocation4], 0  ;;  %s441_s21 = smov [#allocation5]   ;;  %s18_s25 = sshll.u32 %s495_s0, 4  ;;  %s19_s25 = int_to_ptr.hbm [resolvable:$true] %s18_s25 }
   0x3   :  { %s30_s22 = sshll.u32 %s441_s21, 4  ;;  %s442_s26 = smov 64   ;;  %s31_s22 = int_to_ptr.vmem [resolvable:$true] %s30_s22 }
   0x4   :  { %s443_s27 = smov 4   ;;  %s444_s28 = smov [#allocation2]  }
   0x5   :  { %36 = dma.hbm_to_vmem [thread:$0]  %s29_s20, 1024, %s31_s22, [#allocation6], %s442_s26, %s442_s26, %s443_s27  }
   0x6   :  { %s20_s29 = sshll.u32 %s444_s28, 4  ;;  %s43_s7 = sshll.u32 %s498_s3, 4  ;;  %s21_s29 = int_to_ptr.vmem [resolvable:$true] %s20_s29  ;;  %s44_s7 = int_to_ptr.hbm [resolvable:$true] %s43_s7 }
   0x7   :  { %23 = dma.hbm_to_vmem [thread:$0]  %s19_s25, 64, %s21_s29, [#allocation3]  }
   0x8   :  { %s445_s1 = smov [#allocation7]  }
   0x9   :  { %s45_s8 = sshll.u32 %s445_s1, 4  ;;  %s46_s8 = int_to_ptr.vmem [resolvable:$true] %s45_s8 }
   0xa   :  { %51 = dma.hbm_to_vmem [thread:$0]  %s44_s7, 1024, %s46_s8, [#allocation6], %s442_s26, %s442_s26, %s443_s27  }
   0xb   :  { %435 = dma.done.wait [#allocation3], 64  }
   0xc   :  { %436 = vsyncadd [#allocation3], 4294967232 }
   0xd   :  { %437 = dma.done.wait [#allocation6], 2048  }
   0xe   :  { %438 = vsyncadd [#allocation6], 4294965248  ;;  %v322_v0 = vld [vmem:[#allocation5 + $0x38] sm:$0xff]  ;;  %v321_v1 = vld [vmem:[#allocation5 + $0x30] sm:$0xff]  ;;  %s446_s11 = smov [#allocation8]   ;;  %s240_s15 = sshll.u32 %s500_s5, 4  ;;  %s241_s15 = int_to_ptr.hbm [resolvable:$true] %s240_s15 }
   0xf   :  { %135 = vmatpush.bf16.msra.mxu0 %v322_v0  ;;  %v330_v2 = vld [vmem:[#allocation7 + $0x38] sm:$0xff]  ;;  %v329_v3 = vld [vmem:[#allocation7 + $0x30] sm:$0xff]  ;;  %v320_v4 = vld [vmem:[#allocation5 + $0x28] sm:$0xff]  ;;  %s238_s12 = sshll.u32 %s446_s11, 4  ;;  %s239_s12 = int_to_ptr.vmem [resolvable:$true] %s238_s12 }
  0x10   :  { %218 = vmatpush.bf16.msra.mxu1 %v330_v2  ;;  %v328_v5 = vld [vmem:[#allocation7 + $0x28] sm:$0xff]  ;;  %v319_v6 = vld [vmem:[#allocation5 + $0x20] sm:$0xff]  ;;  %v318_v8 = vld [vmem:[#allocation5 + $0x18] sm:$0xff] }
  0x11   :  { %v327_v7 = vld [vmem:[#allocation7 + $0x20] sm:$0xff]  ;;  %v326_v9 = vld [vmem:[#allocation7 + $0x18] sm:$0xff]  ;;  %v317_v10 = vld [vmem:[#allocation5 + $0x10] sm:$0xff] }
  0x12   :  { %v325_v11 = vld [vmem:[#allocation7 + $0x10] sm:$0xff]  ;;  %v316_v12 = vld [vmem:[#allocation5 + $0x8] sm:$0xff]  ;;  %v315_v13 = vld [vmem:[#allocation5] sm:$0xff] }
  0x13   :  { %136 = vmatpush.bf16.msra.mxu0 %v321_v1  ;;  %v66_v14 = vld [vmem:[#allocation2] sm:$0xf]  ;;  %v324_v15 = vld [vmem:[#allocation7 + $0x8] sm:$0xff]  ;;  %v323_v16 = vld [vmem:[#allocation7] sm:$0xff] }
  0x14   :  { %219 = vmatpush.bf16.msra.mxu1 %v329_v3  ;;  %v337_v17 = vld [vmem:[%s497_s2] ss:$0 sm:$0xff] }
  0x15   :  { %v338_v23 = vld [vmem:[%s499_s4] ss:$0 sm:$0xff] }
  0x17   :  { %137 = vmatpush.bf16.msra.mxu0 %v320_v4 }
  0x18   :  { %220 = vmatpush.bf16.msra.mxu1 %v328_v5 }
  0x1b   :  { %138 = vmatpush.bf16.msra.mxu0 %v319_v6 }
  0x1c   :  { %221 = vmatpush.bf16.msra.mxu1 %v327_v7 }
  0x1f   :  { %139 = vmatpush.bf16.msra.mxu0 %v318_v8 }
  0x20   :  { %222 = vmatpush.bf16.msra.mxu1 %v326_v9 }
  0x23   :  { %140 = vmatpush.bf16.msra.mxu0 %v317_v10 }
  0x24   :  { %223 = vmatpush.bf16.msra.mxu1 %v325_v11 }
  0x27   :  { %141 = vmatpush.bf16.msra.mxu0 %v316_v12 }
  0x28   :  { %224 = vmatpush.bf16.msra.mxu1 %v324_v15 }
  0x2b   :  { %142 = vmatpush.bf16.msra.mxu0 %v315_v13 }
  0x2c   :  { %225 = vmatpush.bf16.msra.mxu1 %v323_v16 }
  0x2e   :  { %143 = vmatmul.bf16.vlgmr.msra.gmra.mxu0 %v66_v14 }
  0xab   :  { %v144_v18 = vpop.f32.mrf.mxu0 }
  0xac   :  { %v145_v19 = vadd.f32 %v337_v17, %v144_v18 }
  0xae   :  { %v148_v20 = vmax.f32 %v145_v19, 0.0 }
  0xb0   :  { %v149_v21 = vpack.c.bf16 %v148_v20, %v148_v20 }
  0xb2   :  { %226 = vmatmul.bf16.vlgmr.msra.gmra.mxu1 %v149_v21 }
  0xb3   :  { %v146_v22 = vpop.f32.mrf.mxu0 }
 0x12f   :  { %v227_v24 = vpop.f32.mrf.mxu1 }
 0x130   :  { %v228_v25 = vadd.f32 %v338_v23, %v227_v24 }
 0x132   :  { %v231_v26 = vmax.f32 %v228_v25, 0.0 }
 0x134   :  { %232 = vst [vmem:[#allocation8] sm:$0xff] %v231_v26 }
 0x135   :  { %243 = dma.vmem_to_hbm [thread:$0]  %s239_s12, 128, %s241_s15, [#allocation4]  }
 0x137   :  { %v229_v27 = vpop.f32.mrf.mxu1 }
 0x138   :  { %439 = dma.done.wait [#allocation4], 128  }
 0x139   :  { %440 = vsyncadd [#allocation4], 4294967168 }
 0x13a   :  { %248 = vsyncpa [#allocation3], 1 }
 0x13b   :  { %249 = vsyncpa [#allocation6], 1 }
 0x13c   :  { %250 = vsyncpa [#allocation4], 1 }

</bundles_post_ra>
